<compile_context>
chip_gen: v7x
topology: tpu7x:2x2x1
jax: 0.10.0
libtpu: 0.0.40
codegen_flags: <defaults>
</compile_context>

<pallas_src>
import jax
import jax.numpy as jnp
from jax import lax
from jax.experimental import pallas as pl
from jax.experimental.pallas import tpu as pltpu

# Finite stand-in for -inf in the running max: keeps fully-masked chunks from
# generating NaN (-inf - -inf) inside the online-softmax update.
_SCORE_FLOOR = float(jnp.finfo(jnp.float32).min)


def _make_kernel(ns: int):
    """Kernel closure over the (static) number of sequence chunks `ns`."""

    def kernel(enc_ref, kproj_ref, bias_ref, mask_ref, out_ref, m_ref, l_ref):
        s = pl.program_id(1)

        # Fresh online-softmax statistics at the start of every batch tile.
        @pl.when(s == 0)
        def _():
            m_ref[...] = jnp.full_like(m_ref, _SCORE_FLOOR)
            l_ref[...] = jnp.zeros_like(l_ref)

        # Fused score for this (batch tile, sequence chunk):
        #   scores[b, s] = enc[s, b, :] . kproj[b, :] + bias[b]
        # computed directly on the native (S_TILE, TB, E) layout: VPU multiply
        # + lane reduce over E, then a small (S_TILE, TB)->(TB, S_TILE)
        # transpose (only O(S_TILE*TB) XLU work, E x smaller than the reduce).
        enc = enc_ref[...].astype(jnp.float32)                 # (ST, TB, E)
        kp = kproj_ref[...]                                    # (TB, E)
        scores_st = jnp.sum(enc * kp[None, :, :], axis=-1)     # (ST, TB)
        scores = scores_st.T + bias_ref[...]                   # (TB, ST)
        scores = jnp.where(mask_ref[...] != 0, scores, -jnp.inf)

        # Stash raw masked scores; the output block is resident across the s
        # axis (index_map independent of s), so it doubles as the score buffer.
        out_ref[s] = scores

        # Online softmax statistics.
        m_prev = m_ref[...]
        m_new = jnp.maximum(m_prev, jnp.max(scores, axis=-1, keepdims=True))
        alpha = jnp.exp(m_prev - m_new)
        l_ref[...] = l_ref[...] * alpha + jnp.sum(
            jnp.exp(scores - m_new), axis=-1, keepdims=True)
        m_ref[...] = m_new

        # Finalize: normalize every stored chunk with the exact (m, l).
        @pl.when(s == ns - 1)
        def _():
            m = m_ref[...]
            inv_l = pl.reciprocal(l_ref[...], approx=False)

            def body(i, carry):
                out_ref[i] = jnp.exp(out_ref[i] - m) * inv_l
                return carry

            lax.fori_loop(0, ns, body, 0)

    return kernel


def multiplicative_attention(enc_outputs_sbe, dec_hiddens, src_mask, params, *,
                             batch_tile=32, seq_tile=None,
                             enc_block_budget_bytes=24 << 20):
    """enc_outputs_sbe: (S, B, E); dec_hiddens: (B, D); src_mask: (B, S) bool."""
    wk, bk, wv, bv = params["wk"], params["bk"], params["wv"], params["bv"]
    S, B, E = enc_outputs_sbe.shape

    # ---- tiny projections hoisted to XLA (negligible flops, frees kernel VMEM)
    key = dec_hiddens.astype(jnp.float32) @ wk.T.astype(jnp.float32) \
        + bk.astype(jnp.float32)                                   # (B, A)
    kproj = key @ wv.astype(jnp.float32)                           # (B, E)
    bias = (key @ bv.astype(jnp.float32))[:, None]                 # (B, 1)

    # ---- batch tile (multiple of 32 keeps int8 mask / bf16 enc blocks on
    # native sublane tiling; full-B blocks are always legal).
    if B <= batch_tile:
        TB = B
    else:
        assert batch_tile % 32 == 0, "batch_tile must be a multiple of 32"
        TB = batch_tile
    nb = pl.cdiv(B, TB)

    # ---- sequence tile: bound the double-buffered enc block in VMEM.
    esz = jnp.dtype(enc_outputs_sbe.dtype).itemsize
    if seq_tile is not None:
        S_TILE = min(int(seq_tile), S)
    elif 2 * S * TB * E * esz <= enc_block_budget_bytes:
        S_TILE = S
    else:
        S_TILE = max(128, (enc_block_budget_bytes // (2 * TB * E * esz)) // 128 * 128)
        S_TILE = min(S_TILE, S)
    if S_TILE < S:
        assert S_TILE % 128 == 0, "sequence tile must be a multiple of 128"
    ns = pl.cdiv(S, S_TILE)
    S_pad = ns * S_TILE

    # ---- mask: int8, padded along S only (tiny).  enc is NEVER padded/copied.
    mask = src_mask.astype(jnp.int8)
    if S_pad != S:
        mask = jnp.pad(mask, ((0, 0), (0, S_pad - S)))   # pad positions masked out

    # ---- explicit VMEM budget (double-buffered blocks + resident output + slack)
    vmem_limit = int(
        2 * (S_TILE * TB * E * esz)                 # enc block (double buffered)
        + 2 * (TB * E * 4 + TB * 4 + TB * S_TILE)   # kproj / bias / mask blocks
        + 2 * (ns * TB * S_TILE * 4)                # resident output block
        + 2 * (2 * TB * 4)                          # m / l scratch
        + (4 << 20))                                # slack
    vmem_limit = min(max(vmem_limit, 32 << 20), 100 << 20)

    out = pl.pallas_call(
        _make_kernel(ns),
        out_shape=jax.ShapeDtypeStruct((ns, B, S_TILE), jnp.float32),
        grid=(nb, ns),
        in_specs=[
            pl.BlockSpec((S_TILE, TB, E), lambda b, s: (s, b, 0)),  # enc (S,B,E)
            pl.BlockSpec((TB, E), lambda b, s: (b, 0)),             # kproj
            pl.BlockSpec((TB, 1), lambda b, s: (b, 0)),             # bias
            pl.BlockSpec((TB, S_TILE), lambda b, s: (b, s)),        # mask (int8)
        ],
        out_specs=pl.BlockSpec((ns, TB, S_TILE), lambda b, s: (0, b, 0)),
        scratch_shapes=[pltpu.VMEM((TB, 1), jnp.float32),           # running max
                        pltpu.VMEM((TB, 1), jnp.float32)],          # running sum
        compiler_params=pltpu.CompilerParams(
            dimension_semantics=("parallel", "arbitrary"),
            vmem_limit_bytes=vmem_limit),
    )(enc_outputs_sbe, kproj, bias, mask)

    # (ns, B, S_TILE) -> (B, S): touches only the small output tensor.
    out = jnp.transpose(out, (1, 0, 2)).reshape(B, S_pad)
    return out[:, :S]


def _reference(enc_outputs_sbe, dec_hiddens, src_mask, params):
    """Plain-JAX mirror of the PyTorch forward, for correctness checking."""
    wk, bk, wv, bv = params["wk"], params["bk"], params["wv"], params["bv"]
    enc = jnp.transpose(enc_outputs_sbe.astype(jnp.float32), (1, 0, 2))  # (B,S,E)
    value = enc @ wv.T + bv                                   # (B, S, A)
    key = dec_hiddens @ wk.T + bk                             # (B, A)
    weights = jnp.einsum("bsa,ba->bs", value, key)            # (B, S)
    weights = jnp.where(src_mask, weights, -jnp.inf)
    return jax.nn.softmax(weights, axis=1)


if __name__ == "__main__":
    def make_case(key, B, S, D, E, A, enc_dtype=jnp.float32):
        ks = jax.random.split(key, 7)
        params = {
            "wk": 0.1 * jax.random.normal(ks[0], (A, D), jnp.float32),
            "bk": 0.1 * jax.random.normal(ks[1], (A,), jnp.float32),
            "wv": 0.1 * jax.random.normal(ks[2], (A, E), jnp.float32),
            "bv": 0.1 * jax.random.normal(ks[3], (A,), jnp.float32),
        }
        enc = jax.random.normal(ks[4], (S, B, E), jnp.float32).astype(enc_dtype)
        dec = jax.random.normal(ks[5], (B, D), jnp.float32)
        mask = jax.random.bernoulli(ks[6], 0.7, (B, S))
        mask = mask.at[:, 0].set(True)   # avoid fully-masked rows (torch -> NaN)
        return enc, dec, mask, params

    root = jax.random.PRNGKey(0)
    k1, k2, k3 = jax.random.split(root, 3)

    # Case 1: tiny -> single block (TB = B, one sequence chunk).
    enc, dec, mask, params = make_case(k1, B=2, S=8, D=32, E=32, A=32)
    out = jax.block_until_ready(multiplicative_attention(enc, dec, mask, params))
    ref = _reference(enc, dec, mask, params)
    assert out.shape == (2, 8)
    assert jnp.allclose(out, ref, atol=2e-5, rtol=2e-5), "case 1 mismatch"
    assert jnp.allclose(jnp.sum(out, axis=1), 1.0, atol=1e-5)

    # Case 2: ragged batch (B=34, TB=32) + ragged sequence (S=200, S_TILE=128):
    # exercises boundary blocks with NO enc padding and the online softmax.
    enc, dec, mask, params = make_case(k2, B=34, S=200, D=48, E=64, A=32)
    out = jax.block_until_ready(
        multiplicative_attention(enc, dec, mask, params,
                                 batch_tile=32, seq_tile=128))
    ref = _reference(enc, dec, mask, params)
    assert out.shape == (34, 200)
    assert jnp.allclose(out, ref, atol=2e-5, rtol=2e-5), "case 2 mismatch"
    assert jnp.allclose(jnp.sum(out, axis=1), 1.0, atol=1e-5)

    # Case 3: bf16 encoder states (halved HBM traffic), f32 accumulation.
    enc, dec, mask, params = make_case(k3, B=6, S=256, D=32, E=64, A=32,
                                       enc_dtype=jnp.bfloat16)
    out = jax.block_until_ready(
        multiplicative_attention(enc, dec, mask, params, seq_tile=128))
    ref = _reference(enc, dec, mask, params)
    assert out.shape == (6, 256)
    assert jnp.allclose(out, ref, atol=5e-4, rtol=5e-4), "case 3 mismatch"
    assert jnp.allclose(jnp.sum(out, axis=1), 1.0, atol=1e-4)

    print("KERNEL_OK")
</pallas_src>

<mosaic_0001>
module attributes {stable_mosaic.version = 11 : i64} {
  func.func @kernel(%arg0: i32, %arg1: i32, %arg2: memref<8x2x32xf32, #tpu.memory_space<vmem>>, %arg3: memref<2x32xf32, #tpu.memory_space<vmem>>, %arg4: memref<2x1xf32, #tpu.memory_space<vmem>>, %arg5: memref<2x8xi8, #tpu.memory_space<vmem>>, %arg6: memref<1x2x8xf32, #tpu.memory_space<vmem>>, %arg7: memref<2x1xf32, #tpu.memory_space<vmem>>, %arg8: memref<2x1xf32, #tpu.memory_space<vmem>>) attributes {dimension_semantics = [#tpu.dimension_semantics<parallel>, #tpu.dimension_semantics<arbitrary>], iteration_bounds = array<i64: 1, 1>, scalar_prefetch = 0 : i64, scratch_operands = 2 : i64, tpu.core_type = #tpu.core_type<tc>, window_params = [{transform_indices = @transform_0, window_bounds = array<i64: 8, 2, 32>}, {transform_indices = @transform_1, window_bounds = array<i64: 2, 32>}, {transform_indices = @transform_2, window_bounds = array<i64: 2, 1>}, {transform_indices = @transform_3, window_bounds = array<i64: 2, 8>}, {transform_indices = @transform_4, window_bounds = array<i64: 1, 2, 8>}]} {
    %c0_i32 = arith.constant 0 : i32
    %0 = arith.cmpi eq, %arg1, %c0_i32 : i32
    %1 = arith.extui %0 : i1 to i32
    %c0_i32_0 = arith.constant 0 : i32
    %2 = arith.cmpi ne, %1, %c0_i32_0 : i32
    scf.if %2 {
      %cst_24 = arith.constant -3.40282347E+38 : f32
      %41 = vector.broadcast %cst_24 : f32 to vector<2x1xf32>
      %c0_25 = arith.constant 0 : index
      %c0_26 = arith.constant 0 : index
      %42 = vector.load %arg7[%c0_25, %c0_26] : memref<2x1xf32, #tpu.memory_space<vmem>>, vector<2x1xf32>
      tpu.vector_store %arg7[%c0_25, %c0_26], %41 {strides = array<i32>} : memref<2x1xf32, #tpu.memory_space<vmem>>, vector<2x1xf32>,
      %cst_27 = arith.constant 0.000000e+00 : f32
      %43 = vector.broadcast %cst_27 : f32 to vector<2x1xf32>
      %c0_28 = arith.constant 0 : index
      %c0_29 = arith.constant 0 : index
      %44 = vector.load %arg8[%c0_28, %c0_29] : memref<2x1xf32, #tpu.memory_space<vmem>>, vector<2x1xf32>
      tpu.vector_store %arg8[%c0_28, %c0_29], %43 {strides = array<i32>} : memref<2x1xf32, #tpu.memory_space<vmem>>, vector<2x1xf32>,
    } else {
    }
    %c0 = arith.constant 0 : index
    %c0_1 = arith.constant 0 : index
    %c0_2 = arith.constant 0 : index
    %3 = vector.load %arg2[%c0, %c0_1, %c0_2] : memref<8x2x32xf32, #tpu.memory_space<vmem>>, vector<8x2x32xf32>
    %c0_3 = arith.constant 0 : index
    %c0_4 = arith.constant 0 : index
    %4 = vector.load %arg3[%c0_3, %c0_4] : memref<2x32xf32, #tpu.memory_space<vmem>>, vector<2x32xf32>
    %5 = vector.shape_cast %4 : vector<2x32xf32> to vector<1x2x32xf32>
    %6 = vector.broadcast %5 : vector<1x2x32xf32> to vector<8x2x32xf32>
    %7 = arith.mulf %3, %6 : vector<8x2x32xf32>
    %cst = arith.constant dense<0.000000e+00> : vector<8x2xf32>
    %8 = vector.multi_reduction <add>, %7, %cst [2] : vector<8x2x32xf32> to vector<8x2xf32>
    %9 = tpu.transpose %8, [1, 0] : vector<8x2xf32> -> vector<2x8xf32>
    %c0_5 = arith.constant 0 : index
    %c0_6 = arith.constant 0 : index
    %10 = vector.load %arg4[%c0_5, %c0_6] : memref<2x1xf32, #tpu.memory_space<vmem>>, vector<2x1xf32>
    %11 = vector.broadcast %10 : vector<2x1xf32> to vector<2x8xf32>
    %12 = arith.addf %9, %11 : vector<2x8xf32>
    %c0_7 = arith.constant 0 : index
    %c0_8 = arith.constant 0 : index
    %13 = vector.load %arg5[%c0_7, %c0_8] : memref<2x8xi8, #tpu.memory_space<vmem>>, vector<2x8xi8>
    %c0_i8 = arith.constant 0 : i8
    %14 = vector.broadcast %c0_i8 : i8 to vector<2x8xi8>
    %15 = arith.cmpi ne, %13, %14 : vector<2x8xi8>
    %cst_9 = arith.constant 0xFF800000 : f32
    %16 = vector.broadcast %cst_9 : f32 to vector<2x8xf32>
    %17 = arith.select %15, %12, %16 : vector<2x8xi1>, vector<2x8xf32>
    %18 = arith.index_cast %arg1 : i32 to index
    %c0_10 = arith.constant 0 : index
    %c0_11 = arith.constant 0 : index
    %19 = vector.load %arg6[%18, %c0_10, %c0_11] : memref<1x2x8xf32, #tpu.memory_space<vmem>>, vector<1x2x8xf32>
    %20 = vector.shape_cast %19 : vector<1x2x8xf32> to vector<2x8xf32>
    %21 = vector.shape_cast %17 : vector<2x8xf32> to vector<1x2x8xf32>
    tpu.vector_store %arg6[%18, %c0_10, %c0_11], %21 {strides = array<i32>} : memref<1x2x8xf32, #tpu.memory_space<vmem>>, vector<1x2x8xf32>,
    %c0_12 = arith.constant 0 : index
    %c0_13 = arith.constant 0 : index
    %22 = vector.load %arg7[%c0_12, %c0_13] : memref<2x1xf32, #tpu.memory_space<vmem>>, vector<2x1xf32>
    %cst_14 = arith.constant dense<0xFF800000> : vector<2xf32>
    %23 = vector.multi_reduction <maximumf>, %17, %cst_14 [1] : vector<2x8xf32> to vector<2xf32>
    %24 = vector.shape_cast %23 : vector<2xf32> to vector<2x1xf32>
    %25 = arith.maximumf %22, %24 : vector<2x1xf32>
    %26 = arith.subf %22, %25 : vector<2x1xf32>
    %27 = math.exp %26 : vector<2x1xf32>
    %c0_15 = arith.constant 0 : index
    %c0_16 = arith.constant 0 : index
    %28 = vector.load %arg8[%c0_15, %c0_16] : memref<2x1xf32, #tpu.memory_space<vmem>>, vector<2x1xf32>
    %29 = arith.mulf %28, %27 : vector<2x1xf32>
    %30 = vector.broadcast %25 : vector<2x1xf32> to vector<2x8xf32>
    %31 = arith.subf %17, %30 : vector<2x8xf32>
    %32 = math.exp %31 : vector<2x8xf32>
    %cst_17 = arith.constant dense<0.000000e+00> : vector<2xf32>
    %33 = vector.multi_reduction <add>, %32, %cst_17 [1] : vector<2x8xf32> to vector<2xf32>
    %34 = vector.shape_cast %33 : vector<2xf32> to vector<2x1xf32>
    %35 = arith.addf %29, %34 : vector<2x1xf32>
    %c0_18 = arith.constant 0 : index
    %c0_19 = arith.constant 0 : index
    %36 = vector.load %arg8[%c0_18, %c0_19] : memref<2x1xf32, #tpu.memory_space<vmem>>, vector<2x1xf32>
    tpu.vector_store %arg8[%c0_18, %c0_19], %35 {strides = array<i32>} : memref<2x1xf32, #tpu.memory_space<vmem>>, vector<2x1xf32>,
    %c0_20 = arith.constant 0 : index
    %c0_21 = arith.constant 0 : index
    %37 = vector.load %arg7[%c0_20, %c0_21] : memref<2x1xf32, #tpu.memory_space<vmem>>, vector<2x1xf32>
    tpu.vector_store %arg7[%c0_20, %c0_21], %25 {strides = array<i32>} : memref<2x1xf32, #tpu.memory_space<vmem>>, vector<2x1xf32>,
    %c0_i32_22 = arith.constant 0 : i32
    %38 = arith.cmpi eq, %arg1, %c0_i32_22 : i32
    %39 = arith.extui %38 : i1 to i32
    %c0_i32_23 = arith.constant 0 : i32
    %40 = arith.cmpi ne, %39, %c0_i32_23 : i32
    scf.if %40 {
      %c0_24 = arith.constant 0 : index
      %c0_25 = arith.constant 0 : index
      %41 = vector.load %arg7[%c0_24, %c0_25] : memref<2x1xf32, #tpu.memory_space<vmem>>, vector<2x1xf32>
      %c0_26 = arith.constant 0 : index
      %c0_27 = arith.constant 0 : index
      %42 = vector.load %arg8[%c0_26, %c0_27] : memref<2x1xf32, #tpu.memory_space<vmem>>, vector<2x1xf32>
      %43 = tpu.reciprocal %42 : vector<2x1xf32> -> vector<2x1xf32>
      %c0_i32_28 = arith.constant 0 : i32
      %44 = arith.index_cast %c0_i32_28 : i32 to index
      %c0_29 = arith.constant 0 : index
      %c0_30 = arith.constant 0 : index
      %45 = vector.load %arg6[%44, %c0_29, %c0_30] : memref<1x2x8xf32, #tpu.memory_space<vmem>>, vector<1x2x8xf32>
      %46 = vector.shape_cast %45 : vector<1x2x8xf32> to vector<2x8xf32>
      %47 = vector.broadcast %41 : vector<2x1xf32> to vector<2x8xf32>
      %48 = arith.subf %46, %47 : vector<2x8xf32>
      %49 = math.exp %48 : vector<2x8xf32>
      %50 = vector.broadcast %43 : vector<2x1xf32> to vector<2x8xf32>
      %51 = arith.mulf %49, %50 : vector<2x8xf32>
      %52 = arith.index_cast %c0_i32_28 : i32 to index
      %c0_31 = arith.constant 0 : index
      %c0_32 = arith.constant 0 : index
      %53 = vector.load %arg6[%52, %c0_31, %c0_32] : memref<1x2x8xf32, #tpu.memory_space<vmem>>, vector<1x2x8xf32>
      %54 = vector.shape_cast %53 : vector<1x2x8xf32> to vector<2x8xf32>
      %55 = vector.shape_cast %51 : vector<2x8xf32> to vector<1x2x8xf32>
      tpu.vector_store %arg6[%52, %c0_31, %c0_32], %55 {strides = array<i32>} : memref<1x2x8xf32, #tpu.memory_space<vmem>>, vector<1x2x8xf32>,
      %c1_i32 = arith.constant 1 : i32
    } else {
    }
    return
  }
  func.func @transform_0(%arg0: i32, %arg1: i32) -> (i32, i32, i32) {
    %c0_i32 = arith.constant 0 : i32
    %c0_i32_0 = arith.constant 0 : i32
    return %arg1, %arg0, %c0_i32 : i32, i32, i32
  }
  func.func @transform_1(%arg0: i32, %arg1: i32) -> (i32, i32) {
    %c0_i32 = arith.constant 0 : i32
    %c0_i32_0 = arith.constant 0 : i32
    return %arg0, %c0_i32 : i32, i32
  }
  func.func @transform_2(%arg0: i32, %arg1: i32) -> (i32, i32) {
    %c0_i32 = arith.constant 0 : i32
    %c0_i32_0 = arith.constant 0 : i32
    return %arg0, %c0_i32 : i32, i32
  }
  func.func @transform_3(%arg0: i32, %arg1: i32) -> (i32, i32) {
    %c0_i32 = arith.constant 0 : i32
    return %arg0, %arg1 : i32, i32
  }
  func.func @transform_4(%arg0: i32, %arg1: i32) -> (i32, i32, i32) {
    %c0_i32 = arith.constant 0 : i32
    %c0_i32_0 = arith.constant 0 : i32
    %c0_i32_1 = arith.constant 0 : i32
    return %c0_i32, %arg0, %c0_i32_0 : i32, i32, i32
  }
}

</mosaic_0001>

<bundles_post_ra>
// kernel: tpu_custom_call.1
= control target key start
LH: loop header
LB: loop body
LE: loop exit
PB: predicated region body
PF: predicated region fallthrough
CT: control target
= control target key end

     0   :  { %9 = vsyncpa [#allocation5], 0  ;;  %s397_s0 = inlined_call_operand.hbm [shape: f32[8,2,32], index: 0, kind: input, shape index: {}]   ;;  %s398_s1 = inlined_call_operand.vmem [shape: f32[2,32], index: 1, kind: input, shape index: {}]   ;;  %s399_s2 = inlined_call_operand.vmem [shape: f32[2,1], index: 2, kind: input, shape index: {}]   ;;  %s400_s3 = inlined_call_operand.vmem [shape: s8[2,8], index: 3, kind: input, shape index: {}]   ;;  %s401_s4 = inlined_call_operand.hbm [shape: f32[1,2,8], index: 4, kind: output, shape index: {}]  }
   0x1   :  { %10 = vsyncpa [#allocation6], 0  ;;  %s316_s15 = smov [#allocation4]   ;;  %s268_s19 = scalar_lea.hbm %s397_s0, 256 }
   0x2   :  { %s16_s16 = sshll.u32 %s316_s15, 4  ;;  %p269_p0 = scmp.ne.s32.totalorder %s397_s0, %s268_s19  ;;  %s17_s16 = int_to_ptr.vmem [resolvable:$true] %s16_s16 }
   0x3   :  { %p272_p1 = scmp.lt.u32.totalorder %s268_s19, %s397_s0 }
   0x5   :  { %p274_p2 = pnand %p272_p1, %p269_p0 }
   0x7   :  { %277 = shalt.err (!%p274_p2)
}
   0x8   :  { %s278_s24 = scalar_lea.vmem %s17_s16, 256  ;;  %p283_p4 = scmp.lt.s32.totalorder %s17_s16, %s17_s16 }
   0x9   :  { %p279_p3 = scmp.ne.s32.totalorder %s17_s16, %s278_s24  ;;  %p284_p5 = scmp.lt.s32.totalorder %s278_s24, %s278_s24 }
   0xb   :  { %p285_p6 = por %p284_p5, %p283_p4 }
   0xd   :  { %p286_p7 = pnand %p285_p6, %p279_p3 }
   0xf   :  { %289 = shalt.err (!%p286_p7)
}
  0x10   :  { %s317_s25 = smov 32   ;;  %s318_s26 = smov 2  }
  0x11   :  { %22 = dma.hbm_to_vmem [thread:$0]  %s397_s0, 256, %s17_s16, [#allocation5], %s317_s25, %s317_s25, %s318_s26  }
  0x12   :  { %312 = dma.done.wait [#allocation5], 256  }
  0x13   :  { %313 = vsyncadd [#allocation5], 4294967040  ;;  %vm58_vm0 = vcmask 254976   ;;  %v41_v0 = vld [vmem:[#allocation4] sm:$0x3]  ;;  %v319_v25 = vmov 0   ;;  %v91_v27 = vlaneseq }
  0x14   :  { %v49_v1 = vld [vmem:[%s398_s1] sm:$0x3]  ;;  %v43_v2 = vld [vmem:[#allocation4 + $0x4] sm:$0x3]  ;;  %v42_v5 = vld [vmem:[#allocation4 + $0x2] sm:$0x3]  ;;  %258 = vset.pattern.permute.xlu0 %v319_v25 }
  0x15   :  { %v50_v3 = vmul.f32 %v49_v1, %v41_v0  ;;  %v52_v4 = vmul.f32 %v49_v1, %v43_v2  ;;  %v44_v6 = vld [vmem:[#allocation4 + $0x6] sm:$0x3]  ;;  %v51_v7 = vmul.f32 %v49_v1, %v42_v5  ;;  %v45_v9 = vld [vmem:[#allocation4 + $0x8] sm:$0x3]  ;;  %v46_v10 = vld [vmem:[#allocation4 + $0xa] sm:$0x3] }
  0x16   :  { %v53_v8 = vmul.f32 %v49_v1, %v44_v6  ;;  %v54_v15 = vmul.f32 %v49_v1, %v45_v9  ;;  %v55_v16 = vmul.f32 %v49_v1, %v46_v10  ;;  %v47_v17 = vld [vmem:[#allocation4 + $0xc] sm:$0x3]  ;;  %v48_v18 = vld [vmem:[#allocation4 + $0xe] sm:$0x3]  ;;  %v172_v26 = vld [vmem:[%s399_s2] sm:$0x3] }
  0x17   :  { %v59_v11 = vsel %vm58_vm0, %v50_v3, 0.0  ;;  %v65_v12 = vsel %vm58_vm0, %v52_v4, 0.0  ;;  %v62_v13 = vsel %vm58_vm0, %v51_v7, 0.0  ;;  %v56_v21 = vmul.f32 %v49_v1, %v47_v17  ;;  %v179_v55 = vld [vmem:[%s400_s3] sm:$0x1]  ;;  %s322_s3 = smov [#allocation7]  }
  0x18   :  { %60 = vadd.xlane.f32.xlu0 %v59_v11  ;;  %66 = vadd.xlane.f32.xlu1 %v65_v12  ;;  %v68_v14 = vsel %vm58_vm0, %v53_v8, 0.0  ;;  %v71_v19 = vsel %vm58_vm0, %v54_v15, 0.0  ;;  %v74_v20 = vsel %vm58_vm0, %v55_v16, 0.0  ;;  %v57_v22 = vmul.f32 %v49_v1, %v48_v18  ;;  %s242_s6 = sshll.u32 %s322_s3, 4  ;;  %s243_s6 = int_to_ptr.vmem [resolvable:$true] %s242_s6 }
  0x19   :  { %v77_v23 = vsel %vm58_vm0, %v56_v21, 0.0  ;;  %v92_v28 = vand.u32 127, %v91_v27  ;;  %v94_v29 = vshrl.u32 %v91_v27, 7  ;;  %vm125_vm1 = vcmask 1041409   ;;  %s290_s7 = scalar_lea.vmem %s243_s6, 32  ;;  %p295_p9 = scmp.lt.s32.totalorder %s243_s6, %s243_s6 }
  0x1a   :  { %v80_v24 = vsel %vm58_vm0, %v57_v22, 0.0  ;;  %vm127_vm2 = vcmask 1042434   ;;  %vm129_vm3 = vcmask 1043459   ;;  %vm131_vm4 = vcmask 1044484   ;;  %p291_p8 = scmp.ne.s32.totalorder %s243_s6, %s290_s7  ;;  %p296_p10 = scmp.lt.s32.totalorder %s290_s7, %s290_s7 }
  0x1b   :  { %v95_v32 = vsub.s32 %v92_v28, %v94_v29  ;;  %vm133_vm5 = vcmask 1045509   ;;  %vm135_vm6 = vcmask 1046534   ;;  %vm137_vm7 = vcmask 1047559  }
  0x1c   :  { %63 = vadd.xlane.f32.xlu0 %v62_v13  ;;  %69 = vadd.xlane.f32.xlu1 %v68_v14  ;;  %vm38_vm8 = vcmask 1024   ;;  %v320_v54 = vmov -3.4028235e+38   ;;  %vm180_vm9 = vnez %v179_v55  ;;  %vm187_vm11 = vcmask 58368   ;;  %p297_p11 = por %p296_p10, %p295_p9 }
  0x1d   :  { %39 = vst.msk [vmem:[#allocation2] sm:$0x3] %vm38_vm8, %v320_v54  ;;  %v181_v56 = vsel %vm180_vm9, 16843009, %v319_v25  ;;  %v321_v63 = vmov 0.0  }
  0x1e   :  { %v182_v57 = vunpack.c.0.s8 %v181_v56  ;;  %40 = vst.msk [vmem:[#allocation3] sm:$0x3] %vm38_vm8, %v321_v63  ;;  %p298_p12 = pnand %p297_p11, %p291_p8 }
  0x20   :  { %72 = vadd.xlane.f32.xlu0 %v71_v19  ;;  %75 = vadd.xlane.f32.xlu1 %v74_v20  ;;  %vm183_vm10 = vcmp.ne.s32.totalorder %v182_v57, 0 }
  0x24   :  { %78 = vadd.xlane.f32.xlu0 %v77_v23  ;;  %81 = vadd.xlane.f32.xlu1 %v80_v24  ;;  %v189_v0 = vld [vmem:[#allocation2] sm:$0x3] }
  0x25   :  { %v197_v12 = vld [vmem:[#allocation3] sm:$0x3] }
  0x3a   :  { %175 = vperm.xlu0 %258, %v172_v26  }
  0xa5   :  { %v61_v30 = vpop.xlane.xlu0 %60  ;;  %v67_v31 = vpop.xlane.xlu1 %66 }
  0xa6   :  { %v96_v35 = vrot.slane %v61_v30, %v95_v32  ;;  %v104_v38 = vrot.slane %v67_v31, %v95_v32 }
  0xa9   :  { %v64_v33 = vpop.xlane.xlu0 %63  ;;  %v70_v34 = vpop.xlane.xlu1 %69 }
  0xaa   :  { %v100_v36 = vrot.slane %v64_v33, %v95_v32  ;;  %v108_v37 = vrot.slane %v70_v34, %v95_v32 }
  0xac   :  { %v126_v39 = vsel %vm125_vm1, %v100_v36, %v96_v35 }
  0xad   :  { %v128_v40 = vsel %vm127_vm2, %v104_v38, %v126_v39  ;;  %v73_v41 = vpop.xlane.xlu0 %72  ;;  %v76_v42 = vpop.xlane.xlu1 %75 }
  0xae   :  { %v130_v43 = vsel %vm129_vm3, %v108_v37, %v128_v40  ;;  %v112_v44 = vrot.slane %v73_v41, %v95_v32  ;;  %v116_v45 = vrot.slane %v76_v42, %v95_v32 }
  0xb0   :  { %v132_v46 = vsel %vm131_vm4, %v112_v44, %v130_v43 }
  0xb1   :  { %v79_v47 = vpop.xlane.xlu0 %78  ;;  %v82_v48 = vpop.xlane.xlu1 %81  ;;  %v134_v51 = vsel %vm133_vm5, %v116_v45, %v132_v46 }
  0xb2   :  { %v120_v49 = vrot.slane %v79_v47, %v95_v32  ;;  %v124_v50 = vrot.slane %v82_v48, %v95_v32 }
  0xb4   :  { %v136_v52 = vsel %vm135_vm6, %v120_v49, %v134_v51 }
  0xb5   :  { %v138_v53 = vsel %vm137_vm7, %v124_v50, %v136_v52 }
  0xb6   :  { %140 = vxpose.xlu1.b32.start.end [1/1] (short) (narrow) %v138_v53, 8 }
  0xb9   :  { %v176_v58 = vpop.permute.xlu0 %175 }
  0xd4   :  { %259 = vset.pattern.permute.xlu1 %v319_v25 }
 0x136   :  { %v156_v59 = vpop.trf.xlu1 }
 0x137   :  { %v178_v60 = vadd.f32 %v176_v58, %v156_v59 }
 0x139   :  { %v184_v61 = vsel %vm183_vm10, %v178_v60, -inf }
 0x13a   :  { %v190_v62 = vsel %vm187_vm11, %v184_v61, -inf  ;;  %188 = vst.msk [vmem:[#allocation7] sm:$0x3] %vm187_vm11, %v184_v61 }
 0x13b   :  { %191 = vmax.xlane.f32.xlu0 %v190_v62 }
 0x141   :  { %v220_v19 = vld [vmem:[#allocation7] sm:$0x3] }
 0x1c8   :  { %v192_v1 = vpop.xlane.xlu0 %191 }
 0x1c9   :  { %v193_v2 = vmax.f32 %v189_v0, %v192_v1 }
 0x1cb   :  { %v194_v3 = vsub.f32 %v189_v0, %v193_v2  ;;  %213 = vst.msk [vmem:[#allocation2] sm:$0x3] %vm38_vm8, %v193_v2  ;;  %201 = vperm.xlu1 %259, %v193_v2  }
 0x1cd   :  { %v195_v10 = vmul.f32 1.442695, %v194_v3 }
 0x1d2   :  { %v217_v9 = vld [vmem:[#allocation2] sm:$0x3] }
 0x24a   :  { %v202_v4 = vpop.permute.xlu1 %201 }
 0x24b   :  { %v204_v5 = vsub.f32 %v184_v61, %v202_v4 }
 0x24d   :  { %v205_v6 = vmul.f32 1.442695, %v204_v5 }
 0x24f   :  { %260 = vpow2.f32 %v205_v6 }
 0x250   :  { %262 = vpow2.f32 %v195_v10 }
 0x259   :  { %v261_v7 = vpop.eup %260 }
 0x25a   :  { %v207_v8 = vsel %vm187_vm11, %v261_v7, 0.0  ;;  %v263_v11 = vpop.eup %262 }
 0x25b   :  { %208 = vadd.xlane.f32.xlu0 %v207_v8  ;;  %v198_v13 = vmul.f32 %v263_v11, %v197_v12 }
 0x271   :  { %223 = vperm.xlu0 %258, %v217_v9  }
 0x2e8   :  { %v209_v14 = vpop.xlane.xlu0 %208 }
 0x2e9   :  { %v210_v15 = vadd.f32 %v209_v14, %v198_v13 }
 0x2eb   :  { %212 = vst.msk [vmem:[#allocation3] sm:$0x3] %vm38_vm8, %v210_v15 }
 0x2f0   :  { %v224_v18 = vpop.permute.xlu0 %223 }
 0x2f1   :  { %v226_v20 = vsub.f32 %v220_v19, %v224_v18 }
 0x2f2   :  { %v218_v16 = vld [vmem:[#allocation3] sm:$0x3] }
 0x2f3   :  { %264 = vrcp.f32 %v218_v16  ;;  %v227_v21 = vmul.f32 1.442695, %v226_v20 }
 0x2f5   :  { %266 = vpow2.f32 %v227_v21 }
 0x2fd   :  { %v265_v17 = vpop.eup %264 }
 0x2fe   :  { %231 = vperm.xlu1 %259, %v265_v17  }
 0x2ff   :  { %v267_v22 = vpop.eup %266 }
 0x37d   :  { %v232_v23 = vpop.permute.xlu1 %231 }
 0x37e   :  { %v234_v24 = vmul.f32 %v267_v22, %v232_v23 }
 0x380   :  { %235 = vst.msk [vmem:[#allocation7] sm:$0x3] %vm187_vm11, %v234_v24 }
 0x381   :  { %301 = shalt.err (!%p298_p12)
}
 0x382   :  { %s302_s10 = scalar_lea.hbm %s401_s4, 32 }
 0x383   :  { %p303_p13 = scmp.ne.s32.totalorder %s401_s4, %s302_s10  ;;  %p306_p0 = scmp.lt.u32.totalorder %s302_s10, %s401_s4 }
 0x385   :  { %p308_p1 = pnand %p306_p0, %p303_p13 }
 0x387   :  { %311 = shalt.err (!%p308_p1)
}
 0x388   :  { %245 = dma.vmem_to_hbm [thread:$0]  %s243_s6, 32, %s401_s4, [#allocation6]  }
 0x389   :  { %314 = dma.done.wait [#allocation6], 32  }
 0x38a   :  { %315 = vsyncadd [#allocation6], 4294967264 }
 0x38b   :  { %249 = vsyncpa [#allocation5], 1 }
 0x38c   :  { %250 = vsyncpa [#allocation6], 1 }

</bundles_post_ra>
